<compile_context>
chip_gen: v5e
topology: v5e:2x2
jax: 0.10.0
libtpu: 0.0.40
codegen_flags: <defaults>
</compile_context>

<pallas_src>
import functools
import math

import numpy as np

import jax
import jax.numpy as jnp
from jax.experimental import pallas as pl
from jax.experimental.pallas import tpu as pltpu


def _fixed_embed_kernel(idx_ref, const_ref, o_ref, *, d_model: int):
    """idx_ref: (TILE_M, R) int32 ids.
    const_ref: (3, R * d_model) f32 lane constants
               row 0 = div_term, row 1 = phase (0 or pi/2), row 2 = token slot.
    o_ref: (TILE_M, R * d_model) f32 output."""
    idx = idx_ref[...]
    tile_m, r = idx.shape
    width = r * d_model

    div_term = const_ref[0:1, :]          # (1, width), lane-constant scale
    phase = const_ref[1:2, :]             # (1, width), 0 for sin, pi/2 for cos

    idx_f = idx.astype(jnp.float32)       # cast once, outside any loop
    if r == 1:
        tok = jnp.broadcast_to(idx_f, (tile_m, width))
    else:
        # Expand the R packed ids along the lane axis using the precomputed
        # token-slot row (no in-kernel iota / integer divide).
        token_slot = const_ref[2:3, :]
        tok = jnp.broadcast_to(idx_f[:, 0:1], (tile_m, width))
        for rr in range(1, r):
            tok = jnp.where(token_slot == float(rr), idx_f[:, rr:rr + 1], tok)

    # One transcendental per element: cos(x) == sin(x + pi/2).
    o_ref[...] = jnp.sin(tok * div_term + phase)


def fixed_embedding(x: jnp.ndarray, c_in: int, d_model: int) -> jnp.ndarray:
    """x: (B, L) integer ids in [0, c_in). Returns (B, L, d_model) float32."""
    assert d_model % 2 == 0, "FixedEmbedding requires an even d_model"
    B, L = x.shape
    N = B * L

    # Lane-packing factor: pack R tokens per output row so the store width is
    # a multiple of 128 lanes (unmasked full-lane stores) whenever possible.
    base_r = 128 // math.gcd(d_model, 128)
    if base_r * d_model <= 1024:
        R = base_r
    else:
        R = 1  # TODO(synk): huge lcm(d_model,128) -> masked partial stores.
    width = R * d_model

    # Host-built lane constants (column-only functions).
    cols = np.arange(width)
    d = cols % d_model
    pair = (d // 2).astype(np.float32)                    # sin/cos pair index j
    div_term = np.exp(pair * (-2.0 * math.log(10000.0) / d_model))
    phase = np.where(d % 2 == 0, 0.0, math.pi / 2.0)      # even->sin, odd->cos
    token_slot = (cols // d_model).astype(np.float32)
    consts = jnp.asarray(
        np.stack([div_term, phase, token_slot], axis=0).astype(np.float32))

    # Tokens per grid step: ~8 MiB f32 output tile (double-buffered), rounded
    # to a multiple of 8*R so sublanes stay aligned.
    out_buf_budget = 8 * 1024 * 1024                      # bytes per out buffer
    tokens_per_tile = max(8 * R, out_buf_budget // (d_model * 4))
    tokens_per_tile = max(8 * R, (tokens_per_tile // (8 * R)) * (8 * R))

    n_round = pl.cdiv(N, 8 * R) * (8 * R)
    # v7x: keep at least 2 grid steps when the problem allows, so the single
    # "parallel" axis actually splits across the two TensorCores.
    if n_round >= 2 * (8 * R):
        half = max(8 * R, ((n_round // 2) // (8 * R)) * (8 * R))
        tokens_per_tile = min(tokens_per_tile, half)
    tokens_per_tile = min(tokens_per_tile, n_round)

    n_pad = pl.cdiv(N, tokens_per_tile) * tokens_per_tile
    tile_m = tokens_per_tile // R
    m_rows = n_pad // R

    x_flat = x.reshape(-1).astype(jnp.int32)
    if n_pad != N:
        x_flat = jnp.concatenate([x_flat, jnp.zeros((n_pad - N,), jnp.int32)])
    x_packed = x_flat.reshape(m_rows, R)

    kernel = functools.partial(_fixed_embed_kernel, d_model=d_model)
    out = pl.pallas_call(
        kernel,
        out_shape=jax.ShapeDtypeStruct((m_rows, width), jnp.float32),
        grid=(m_rows // tile_m,),
        in_specs=[
            pl.BlockSpec((tile_m, R), lambda i: (i, 0)),      # packed ids
            pl.BlockSpec((3, width), lambda i: (0, 0)),       # resident consts
        ],
        out_specs=pl.BlockSpec((tile_m, width), lambda i: (i, 0)),
        compiler_params=pltpu.CompilerParams(
            dimension_semantics=("parallel",),
            vmem_limit_bytes=48 * 1024 * 1024),
        cost_estimate=pl.CostEstimate(
            flops=2 * n_pad * d_model,
            transcendentals=n_pad * d_model,
            bytes_accessed=n_pad * d_model * 4 + n_pad * 4),
    )(x_packed, consts)

    # (M, R*d_model) -> (N_pad, d_model) -> drop padding -> (B, L, d_model)
    # TODO(synk): downstream consumers wanting bf16 could take a bf16 out_shape
    # here (~2x store-roofline win) at the cost of f32 parity with PyTorch.
    return out.reshape(n_pad, d_model)[:N].reshape(B, L, d_model)


def make_fixed_embedding_table(c_in: int, d_model: int) -> jnp.ndarray:
    """Reference sinusoidal table, exactly as in the PyTorch __init__."""
    position = jnp.arange(0, c_in, dtype=jnp.float32)[:, None]
    div_term = jnp.exp(jnp.arange(0, d_model, 2, dtype=jnp.float32)
                       * -(math.log(10000.0) / d_model))
    w = jnp.zeros((c_in, d_model), dtype=jnp.float32)
    w = w.at[:, 0::2].set(jnp.sin(position * div_term))
    w = w.at[:, 1::2].set(jnp.cos(position * div_term))
    return w


if __name__ == "__main__":
    c_in, d_model = 16, 32
    B, L = 2, 8

    key = jax.random.PRNGKey(0)
    x = jax.random.randint(key, (B, L), minval=0, maxval=c_in, dtype=jnp.int32)

    out = fixed_embedding(x, c_in, d_model)
    out = jax.block_until_ready(out)

    # Reference: table gather (what nn.Embedding(x).detach() does).
    w = make_fixed_embedding_table(c_in, d_model)
    ref = w[x]

    assert out.shape == (B, L, d_model)
    assert out.dtype == jnp.float32
    assert jnp.allclose(out, ref, atol=1e-5), "mismatch vs reference gather"

    # TODO(synk): nn.Embedding raises on out-of-range ids; the closed-form
    # sinusoid extrapolates instead (there is no table to index out of).

    print("KERNEL_OK")
</pallas_src>

<mosaic_0001>
module attributes {stable_mosaic.version = 11 : i64} {
  func.func @_fixed_embed_kernel(%arg0: i32, %arg1: memref<8x4xi32, #tpu.memory_space<vmem>>, %arg2: memref<3x128xf32, #tpu.memory_space<vmem>>, %arg3: memref<8x128xf32, #tpu.memory_space<vmem>>) attributes {dimension_semantics = [#tpu.dimension_semantics<parallel>], iteration_bounds = array<i64: 1>, scalar_prefetch = 0 : i64, scratch_operands = 0 : i64, tpu.core_type = #tpu.core_type<tc>, window_params = [{transform_indices = @transform_0, window_bounds = array<i64: 8, 4>}, {pipeline_mode = #tpu.pipeline_mode<synchronous>, transform_indices = @transform_1, window_bounds = array<i64: 3, 128>}, {transform_indices = @transform_2, window_bounds = array<i64: 8, 128>}]} {
    %c0 = arith.constant 0 : index
    %c0_0 = arith.constant 0 : index
    %0 = vector.load %arg1[%c0, %c0_0] : memref<8x4xi32, #tpu.memory_space<vmem>>, vector<8x4xi32>
    %c0_1 = arith.constant 0 : index
    %c0_2 = arith.constant 0 : index
    %1 = vector.load %arg2[%c0_1, %c0_2] : memref<3x128xf32, #tpu.memory_space<vmem>>, vector<1x128xf32>
    %c1 = arith.constant 1 : index
    %c0_3 = arith.constant 0 : index
    %2 = vector.load %arg2[%c1, %c0_3] : memref<3x128xf32, #tpu.memory_space<vmem>>, vector<1x128xf32>
    %3 = arith.sitofp %0 : vector<8x4xi32> to vector<8x4xf32>
    %c2 = arith.constant 2 : index
    %c0_4 = arith.constant 0 : index
    %4 = vector.load %arg2[%c2, %c0_4] : memref<3x128xf32, #tpu.memory_space<vmem>>, vector<1x128xf32>
    %5 = vector.extract_strided_slice %3 {offsets = [0, 0], sizes = [8, 1], strides = [1, 1]} : vector<8x4xf32> to vector<8x1xf32>
    %6 = vector.shape_cast %5 : vector<8x1xf32> to vector<8x1xf32>
    %7 = vector.broadcast %6 : vector<8x1xf32> to vector<8x128xf32>
    %cst = arith.constant 1.000000e+00 : f32
    %8 = vector.broadcast %cst : f32 to vector<1x128xf32>
    %9 = arith.cmpf oeq, %4, %8 : vector<1x128xf32>
    %10 = vector.extract_strided_slice %3 {offsets = [0, 1], sizes = [8, 1], strides = [1, 1]} : vector<8x4xf32> to vector<8x1xf32>
    %11 = vector.shape_cast %9 : vector<1x128xi1> to vector<1x128xi1>
    %12 = vector.broadcast %11 : vector<1x128xi1> to vector<8x128xi1>
    %13 = vector.shape_cast %10 : vector<8x1xf32> to vector<8x1xf32>
    %14 = vector.broadcast %13 : vector<8x1xf32> to vector<8x128xf32>
    %15 = arith.select %12, %14, %7 : vector<8x128xi1>, vector<8x128xf32>
    %cst_5 = arith.constant 2.000000e+00 : f32
    %16 = vector.broadcast %cst_5 : f32 to vector<1x128xf32>
    %17 = arith.cmpf oeq, %4, %16 : vector<1x128xf32>
    %18 = vector.extract_strided_slice %3 {offsets = [0, 2], sizes = [8, 1], strides = [1, 1]} : vector<8x4xf32> to vector<8x1xf32>
    %19 = vector.shape_cast %17 : vector<1x128xi1> to vector<1x128xi1>
    %20 = vector.broadcast %19 : vector<1x128xi1> to vector<8x128xi1>
    %21 = vector.shape_cast %18 : vector<8x1xf32> to vector<8x1xf32>
    %22 = vector.broadcast %21 : vector<8x1xf32> to vector<8x128xf32>
    %23 = arith.select %20, %22, %15 : vector<8x128xi1>, vector<8x128xf32>
    %cst_6 = arith.constant 3.000000e+00 : f32
    %24 = vector.broadcast %cst_6 : f32 to vector<1x128xf32>
    %25 = arith.cmpf oeq, %4, %24 : vector<1x128xf32>
    %26 = vector.extract_strided_slice %3 {offsets = [0, 3], sizes = [8, 1], strides = [1, 1]} : vector<8x4xf32> to vector<8x1xf32>
    %27 = vector.shape_cast %25 : vector<1x128xi1> to vector<1x128xi1>
    %28 = vector.broadcast %27 : vector<1x128xi1> to vector<8x128xi1>
    %29 = vector.shape_cast %26 : vector<8x1xf32> to vector<8x1xf32>
    %30 = vector.broadcast %29 : vector<8x1xf32> to vector<8x128xf32>
    %31 = arith.select %28, %30, %23 : vector<8x128xi1>, vector<8x128xf32>
    %32 = vector.broadcast %1 : vector<1x128xf32> to vector<8x128xf32>
    %33 = arith.mulf %31, %32 : vector<8x128xf32>
    %34 = vector.broadcast %2 : vector<1x128xf32> to vector<8x128xf32>
    %35 = arith.addf %33, %34 : vector<8x128xf32>
    %36 = math.sin %35 : vector<8x128xf32>
    %c0_7 = arith.constant 0 : index
    %c0_8 = arith.constant 0 : index
    %37 = vector.load %arg3[%c0_7, %c0_8] : memref<8x128xf32, #tpu.memory_space<vmem>>, vector<8x128xf32>
    tpu.vector_store %arg3[%c0_7, %c0_8], %36 {strides = array<i32>} : memref<8x128xf32, #tpu.memory_space<vmem>>, vector<8x128xf32>,
    return
  }
  func.func @transform_0(%arg0: i32) -> (i32, i32) {
    %c0_i32 = arith.constant 0 : i32
    %c0_i32_0 = arith.constant 0 : i32
    return %arg0, %c0_i32 : i32, i32
  }
  func.func @transform_1(%arg0: i32) -> (i32, i32) {
    %c0_i32 = arith.constant 0 : i32
    %c0_i32_0 = arith.constant 0 : i32
    %c0_i32_1 = arith.constant 0 : i32
    return %c0_i32, %c0_i32_0 : i32, i32
  }
  func.func @transform_2(%arg0: i32) -> (i32, i32) {
    %c0_i32 = arith.constant 0 : i32
    %c0_i32_0 = arith.constant 0 : i32
    return %arg0, %c0_i32 : i32, i32
  }
}

</mosaic_0001>

<bundles_post_ra>
// kernel: tpu_custom_call.1
= control target key start
LH: loop header
LB: loop body
LE: loop exit
PB: predicated region body
PF: predicated region fallthrough
CT: control target
= control target key end

     0   :  { %v272_v1 = vmov 0   ;;  %v273_v3 = vmov 2   ;;  %s375_s0 = inlined_call_operand.vmem [shape: s32[8,4], index: 0, kind: input, shape index: {}]   ;;  %s376_s1 = inlined_call_operand.vmem [shape: f32[3,128], index: 1, kind: input, shape index: {}]   ;;  %s377_s2 = inlined_call_operand.hbm [shape: f32[8,128], index: 2, kind: output, shape index: {}]  }
   0x1   :  { %v12_v0 = vld [vmem:[%s375_s0] sm:$0xff]  ;;  %239 = vset.pattern.permute.xlu0 %v272_v1  ;;  %241 = vset.pattern.permute.xlu1 %v273_v3 }
   0x2   :  { %v15_v2 = vcvt.s32.f32 %v12_v0 }
   0x3   :  { %7 = vsyncpa [#allocation3], 0  ;;  %v274_v4 = vmov 1   ;;  %v275_v5 = vmov 3   ;;  %v16_v6 = vld [vmem:[%s376_s1 + $0x2] sm:$0x1] }
   0x4   :  { %19 = vperm.xlu0 %239, %v15_v2   ;;  %36 = vperm.xlu1 %241, %v15_v2   ;;  %vm22_vm0 = vcmp.eq.f32.partialorder %v16_v6, 1.0  ;;  %vm31_vm1 = vcmp.eq.f32.partialorder %v16_v6, 2.0  ;;  %vm40_vm2 = vcmp.eq.f32.partialorder %v16_v6, 3.0  ;;  %v244_v16 = vld [vmem:[%s376_s1] ss:$0 sm:$0xff]  ;;  %s216_s19 = sshll.u32 %s377_s2, 4  ;;  %s217_s19 = int_to_ptr.hbm [resolvable:$true] %s216_s19 }
   0x5   :  { %v23_v9 = vsel %vm22_vm0, 1, %v272_v1  ;;  %v32_v10 = vsel %vm31_vm1, 1, %v272_v1  ;;  %v41_v11 = vsel %vm40_vm2, 1, %v272_v1  ;;  %v245_v19 = vld [vmem:[%s376_s1 + $0x1] ss:$0 sm:$0xff]  ;;  %s282_s1 = smov [#allocation2]  }
   0x6   :  { %v24_v12 = vperm.slane %v23_v9, 0  ;;  %v33_v13 = vperm.slane %v32_v10, 0  ;;  %v42_v14 = vperm.slane %v41_v11, 0  ;;  %v276_v35 = vmov 2102212464   ;;  %s214_s16 = sshll.u32 %s282_s1, 4  ;;  %s215_s16 = int_to_ptr.vmem [resolvable:$true] %s214_s16 }
   0x7   :  { %v277_v37 = vmov 920167782   ;;  %v278_v40 = vmov 1326507024   ;;  %v279_v42 = vmov 683565275  }
   0x8   :  { %vm25_vm3 = vcmp.eq.s32.totalorder %v24_v12, 1  ;;  %vm34_vm4 = vcmp.eq.s32.totalorder %v33_v13, 1  ;;  %vm43_vm5 = vcmp.eq.s32.totalorder %v42_v14, 1  ;;  %v280_v44 = vmov 2475754826  }
   0x9   :  { %v281_v47 = vmov 2131351028  }
   0xc   :  { %240 = vset.pattern.permute.xlu0 %v274_v4  ;;  %242 = vset.pattern.permute.xlu1 %v275_v5 }
   0xd   :  { %27 = vperm.xlu0 %240, %v15_v2   ;;  %45 = vperm.xlu1 %242, %v15_v2  }
  0x15   :  { %243 = vset.pattern.permute.xlu0 %v275_v5 }
  0x76   :  { %v20_v7 = vpop.permute.xlu0 %19  ;;  %v37_v8 = vpop.permute.xlu1 %36 }
  0x7f   :  { %v28_v15 = vpop.permute.xlu0 %27  ;;  %v46_v17 = vpop.permute.xlu1 %45 }
  0x80   :  { %v30_v18 = vsel %vm25_vm3, %v28_v15, %v20_v7 }
  0x81   :  { %v39_v20 = vsel %vm34_vm4, %v37_v8, %v30_v18 }
  0x82   :  { %v48_v21 = vsel %vm43_vm5, %v46_v17, %v39_v20 }
  0x83   :  { %v50_v22 = vmul.f32 %v244_v16, %v48_v21 }
  0x85   :  { %v314_v23 = vadd.f32 %v245_v19, %v50_v22 }
  0x87   :  { %v56_v24 = vand.u32 2139095040, %v314_v23  ;;  %v53_v27 = vand.u32 2147483647, %v314_v23  ;;  %vm55_vm2 = vcmp.lt.s32.totalorder %v314_v23, 0 }
  0x89   :  { %v57_v25 = vshrl.u32 %v56_v24, 23  ;;  %v60_v29 = vand.u32 8388607, %v53_v27  ;;  %vm54_vm3 = vcmp.le.f32.partialorder %v53_v27, 0.7853982 }
  0x8b   :  { %v225_v26 = vadd.s32 4294967169, %v57_v25  ;;  %v61_v33 = vor.u32 8388608, %v60_v29 }
  0x8d   :  { %v63_v28 = vadd.s32 1, %v225_v26  ;;  %v329_v54 = vshll.u32 %v61_v33, 8 }
  0x8f   :  { %vm64_vm6 = vcmp.gt.s32.totalorder %v63_v28, 0  ;;  %v102_v0 = vand.u32 65535, %v329_v54  ;;  %v103_v3 = vshrl.u32 %v329_v54, 16 }
  0x90   :  { %v65_v30 = vsel %vm64_vm6, %v63_v28, 0 }
  0x91   :  { %v67_v31 = vand.u32 31, %v65_v30  ;;  %v322_v34 = vshrl.u32 %v65_v30, 5 }
  0x93   :  { %v320_v32 = vsub.s32 32, %v67_v31  ;;  %v79_v36 = vshll.u32 %v276_v35, %v67_v31  ;;  %v82_v38 = vshll.u32 %v277_v37, %v67_v31  ;;  %v70_v43 = vshll.u32 %v279_v42, %v67_v31 }
  0x94   :  { %v73_v46 = vshll.u32 %v280_v44, %v67_v31  ;;  %v76_v49 = vshll.u32 %v281_v47, %v67_v31  ;;  %vm88_vm7 = vcmp.lt.s32.totalorder %v322_v34, 4  ;;  %vm85_vm8 = vcmp.lt.s32.totalorder %v322_v34, 1 }
  0x95   :  { %v80_v39 = vshrl.u32 %v277_v37, %v320_v32  ;;  %v83_v41 = vshrl.u32 %v278_v40, %v320_v32  ;;  %v71_v45 = vshrl.u32 %v280_v44, %v320_v32  ;;  %v74_v48 = vshrl.u32 %v281_v47, %v320_v32 }
  0x96   :  { %v77_v50 = vshrl.u32 %v276_v35, %v320_v32  ;;  %vm87_vm9 = vcmp.lt.s32.totalorder %v322_v34, 3  ;;  %vm86_vm10 = vcmp.lt.s32.totalorder %v322_v34, 2  ;;  %v69_v28 = vshrl.u32 %v279_v42, %v320_v32 }
  0x97   :  { %v81_v51 = vor.u32 %v80_v39, %v79_v36  ;;  %v84_v52 = vor.u32 %v83_v41, %v82_v38  ;;  %v72_v53 = vor.u32 %v71_v45, %v70_v43  ;;  %v75_v55 = vor.u32 %v74_v48, %v73_v46 }
  0x98   :  { %v78_v56 = vor.u32 %v77_v50, %v76_v49 }
  0x99   :  { %v94_v57 = vsel %vm88_vm7, %v81_v51, 920167782  ;;  %v98_v58 = vsel %vm88_vm7, %v84_v52, 1326507024  ;;  %v93_v59 = vsel %vm85_vm8, %v72_v53, %v75_v55  ;;  %v89_v36 = vsel %vm85_vm8, %v69_v28, %v72_v53 }
  0x9a   :  { %v95_v60 = vsel %vm87_vm9, %v78_v56, %v94_v57  ;;  %v97_v61 = vsel %vm85_vm8, %v75_v55, %v78_v56  ;;  %v99_v63 = vsel %vm87_vm9, %v81_v51, %v98_v58  ;;  %v90_v24 = vsel %vm88_vm7, %v78_v56, 2102212464 }
  0x9b   :  { %v96_v62 = vsel %vm86_vm10, %v93_v59, %v95_v60  ;;  %v100_v2 = vsel %vm86_vm10, %v97_v61, %v99_v63  ;;  %v91_v37 = vsel %vm87_vm9, %v75_v55, %v90_v24  ;;  %vm196_vm7 = vweird.f32 %v314_v23 }
  0x9c   :  { %v126_v4 = vand.u32 65535, %v96_v62  ;;  %v127_v5 = vshrl.u32 %v96_v62, 16  ;;  %v104_v6 = vand.u32 65535, %v100_v2  ;;  %v105_v7 = vshrl.u32 %v100_v2, 16 }
  0x9d   :  { %v92_v42 = vsel %vm86_vm10, %v89_v36, %v91_v37 }
  0x9e   :  { %v129_v8 = vmul.u32 %v127_v5, %v102_v0  ;;  %v130_v9 = vmul.u32 %v126_v4, %v103_v3  ;;  %v107_v10 = vmul.u32 %v105_v7, %v102_v0  ;;  %v108_v11 = vmul.u32 %v104_v6, %v103_v3 }
  0x9f   :  { %v128_v12 = vmul.u32 %v126_v4, %v102_v0  ;;  %v106_v14 = vmul.u32 %v104_v6, %v102_v0  ;;  %v131_v16 = vmul.u32 %v127_v5, %v103_v3  ;;  %v109_v17 = vmul.u32 %v105_v7, %v103_v3 }
  0xa0   :  { %v132_v13 = vshll.u32 %v129_v8, 16  ;;  %v110_v15 = vshll.u32 %v107_v10, 16  ;;  %v134_v18 = vshll.u32 %v130_v9, 16  ;;  %v112_v20 = vshll.u32 %v108_v11, 16 }
  0xa1   :  { %v133_v33 = vshrl.u32 %v129_v8, 16  ;;  %v111_v38 = vshrl.u32 %v107_v10, 16  ;;  %v135_v40 = vshrl.u32 %v130_v9, 16  ;;  %v113_v43 = vshrl.u32 %v108_v11, 16 }
  0xa2   :  { %vm136_vm11 = vc.u32 %v128_v12, %v132_v13  ;;  %v138_v19 = vadd.s32 %v132_v13, %v128_v12  ;;  %vm114_vm12 = vc.u32 %v106_v14, %v110_v15  ;;  %v116_v21 = vadd.s32 %v110_v15, %v106_v14 }
  0xa3   :  { %v137_v22 = vsel %vm136_vm11, 1, %v272_v1  ;;  %v115_v25 = vsel %vm114_vm12, 1, %v272_v1  ;;  %v146_v47 = vmul.u32 %v329_v54, %v92_v42 }
  0xa4   :  { %v139_v26 = vadd.s32 %v137_v22, %v131_v16  ;;  %vm140_vm13 = vc.u32 %v138_v19, %v134_v18  ;;  %v117_v29 = vadd.s32 %v115_v25, %v109_v17  ;;  %vm118_vm14 = vc.u32 %v116_v21, %v112_v20 }
  0xa5   :  { %v141_v30 = vsel %vm140_vm13, 1, %v272_v1  ;;  %v119_v31 = vsel %vm118_vm14, 1, %v272_v1  ;;  %v142_v1 = vadd.s32 %v138_v19, %v134_v18 }
  0xa6   :  { %v143_v35 = vadd.s32 %v141_v30, %v139_v26  ;;  %v121_v39 = vadd.s32 %v119_v31, %v117_v29 }
  0xa8   :  { %v144_v41 = vadd.s32 %v143_v35, %v133_v33  ;;  %v122_v32 = vadd.s32 %v121_v39, %v111_v38 }
  0xaa   :  { %v145_v44 = vadd.s32 %v144_v41, %v135_v40  ;;  %v123_v45 = vadd.s32 %v122_v32, %v113_v43 }
  0xac   :  { %v149_v46 = vadd.s32 1, %v145_v44  ;;  %vm148_vm15 = vc.u32 %v123_v45, %v142_v1  ;;  %v147_v59 = vadd.s32 %v142_v1, %v123_v45 }
  0xae   :  { %v150_v48 = vsel %vm148_vm15, %v149_v46, %v145_v44 }
  0xaf   :  { %v151_v49 = vadd.s32 %v150_v48, %v146_v47 }
  0xb1   :  { %v152_v50 = vadd.s32 536870912, %v151_v49 }
  0xb3   :  { %v153_v51 = vshrl.u32 %v152_v50, 30 }
  0xb5   :  { %v154_v52 = vshll.u32 %v153_v51, 30  ;;  %v177_v9 = vsub.s32 4, %v153_v51 }
  0xb7   :  { %v155_v53 = vsub.s32 %v151_v49, %v154_v52  ;;  %v178_v14 = vsel %vm55_vm2, %v177_v9, %v153_v51 }
  0xb8   :  { %v180_v17 = vsel %vm54_vm3, 0, %v178_v14 }
  0xb9   :  { %vm156_vm0 = vcmp.lt.s32.totalorder %v155_v53, 0  ;;  %v157_v55 = vsub.s32 0, %v155_v53  ;;  %v197_v22 = vadd.s32 3, %v180_v17 }
  0xbb   :  { %v158_v56 = vsel %vm156_vm0, %v157_v55, %v155_v53  ;;  %v198_v28 = vand.u32 3, %v197_v22 }
  0xbc   :  { %v159_v57 = vclz %v158_v56 }
  0xbd   :  { %vm200_vm4 = vcmp.eq.s32.totalorder %v198_v28, 0  ;;  %vm203_vm5 = vcmp.eq.s32.totalorder %v198_v28, 2  ;;  %vm199_vm6 = vcmp.lt.s32.totalorder %v198_v28, 2 }
  0xbe   :  { %v226_v58 = vadd.s32 4294967294, %v159_v57 }
  0xc0   :  { %vm227_vm1 = vcmp.lt.s32.totalorder %v226_v58, 0 }
  0xc1   :  { %v162_v34 = vsel %vm227_vm1, 0, %v226_v58 }
  0xc2   :  { %v163_v60 = vsub.s32 32, %v162_v34  ;;  %v167_v61 = vsub.s32 4294967266, %v162_v34  ;;  %v164_v62 = vshll.u32 %v155_v53, %v162_v34 }
  0xc4   :  { %v165_v63 = vshrl.u32 %v147_v59, %v163_v60  ;;  %v168_v54 = vadd.s32 127, %v167_v61 }
  0xc6   :  { %v166_v0 = vor.u32 %v165_v63, %v164_v62  ;;  %v169_v2 = vshll.u32 %v168_v54, 23 }
  0xc8   :  { %v170_v3 = vor.u32 4788187, %v169_v2  ;;  %v173_v5 = vcvt.s32.f32 %v166_v0 }
  0xca   :  { %v171_v4 = vand.u32 2147483647, %v170_v3 }
  0xcc   :  { %v174_v6 = vmul.f32 %v173_v5, %v171_v4 }
  0xce   :  { %v175_v7 = vxor.u32 2147483648, %v174_v6 }
  0xd0   :  { %v176_v8 = vsel %vm55_vm2, %v175_v7, %v174_v6 }
  0xd1   :  { %v179_v10 = vsel %vm54_vm3, %v314_v23, %v176_v8 }
  0xd2   :  { %v181_v11 = vmul.f32 %v179_v10, %v179_v10 }
  0xd4   :  { %v182_v12 = vmul.f32 -0.001358992, %v181_v11  ;;  %v189_v13 = vmul.f32 -0.00019511016, %v181_v11 }
  0xd6   :  { %v183_v15 = vadd.f32 0.041655596, %v182_v12  ;;  %v190_v16 = vadd.f32 0.008332121, %v189_v13 }
  0xd8   :  { %v184_v18 = vmul.f32 %v183_v15, %v181_v11  ;;  %v191_v19 = vmul.f32 %v190_v16, %v181_v11 }
  0xda   :  { %v185_v20 = vadd.f32 -0.4999988, %v184_v18  ;;  %v192_v21 = vadd.f32 -0.16666654, %v191_v19 }
  0xdc   :  { %v186_v24 = vmul.f32 %v185_v20, %v181_v11  ;;  %v193_v25 = vmul.f32 %v192_v21, %v181_v11 }
  0xde   :  { %v187_v26 = vadd.f32 1.0, %v186_v24  ;;  %v194_v27 = vadd.f32 1.0, %v193_v25 }
  0xe0   :  { %v195_v29 = vmul.f32 %v194_v27, %v179_v10  ;;  %v204_v30 = vxor.u32 2147483648, %v187_v26 }
  0xe2   :  { %v201_v31 = vxor.u32 2147483648, %v195_v29  ;;  %v205_v35 = vsel %vm203_vm5, %v204_v30, %v195_v29 }
  0xe4   :  { %v202_v33 = vsel %vm200_vm4, %v187_v26, %v201_v31 }
  0xe5   :  { %v206_v36 = vsel %vm199_vm6, %v202_v33, %v205_v35 }
  0xe6   :  { %v207_v37 = vsel %vm196_vm7, nan, %v206_v36 }
  0xe7   :  { %208 = vst [vmem:[#allocation2] sm:$0xff] %v207_v37 }
  0xe8   :  { %219 = dma.vmem_to_hbm [thread:$0]  %s215_s16, 128, %s217_s19, [#allocation3]  }
  0xe9   :  { %270 = dma.done.wait [#allocation3], 128  }
  0xea   :  { %271 = vsyncadd [#allocation3], 4294967168 }
  0xeb   :  { %224 = vsyncpa [#allocation3], 1 }

</bundles_post_ra>
